<compile_context>
chip_gen: v7x
topology: tpu7x:2x2x1
jax: 0.10.0
libtpu: 0.0.40
codegen_flags: <defaults>
</compile_context>

<pallas_src>
import numpy as np
import jax
import jax.numpy as jnp
from jax.experimental import pallas as pl
from jax.experimental.pallas import tpu as pltpu

# ---- module hyper-parameters (consistent with DQNAgent.__init__) ----
DETECTION_SIZE = 4                      # env.max_detections
TRACK_SIZE = 4                          # env.max_tracks
ACTION_PER_DET = TRACK_SIZE + 1         # action_per_detection() = env.max_tracks + 1
EMBED_DIM = 64
HIDDEN_DIM = 64
N_HEADS = 4
HEAD_DIM = EMBED_DIM // N_HEADS
DET_IN = DETECTION_SIZE * 5             # 20
TRK_IN = TRACK_SIZE * 5                 # 20
OUT_DIM = DETECTION_SIZE * ACTION_PER_DET   # 20
E2 = 2 * EMBED_DIM                      # 128 = packed [pos0 | pos1] lane layout


def _round_up(x, m):
    return ((x + m - 1) // m) * m


def _cdiv(a, b):
    return -(-a // b)


def dqn_kernel(det_ref, trk_ref,
               w_det_qkv_ref, w_trk_qkv_ref, b_qkv_ref,
               d_mat_ref, t_mat_ref, pos1_ref,
               w_a1_ref, b_a1_ref,
               w2_ref, b2_ref,
               w_out_ref, b_out_ref,
               o_ref):
    f32 = jnp.float32
    wd = w_det_qkv_ref.dtype

    det = det_ref[...].astype(wd)                                   # (TB, 20)
    trk = trk_ref[...].astype(wd)                                   # (TB, 20)

    # Embedding folded into the fused QKV projection at pack time.  One shot:
    #   qkv = [k0 | k1 | v0 | v1 | q0*scale | q0*scale]   (scale folded in).
    qkv = (jnp.dot(det, w_det_qkv_ref[...], preferred_element_type=f32)
           + jnp.dot(trk, w_trk_qkv_ref[...], preferred_element_type=f32)
           + b_qkv_ref[...])                                        # (TB, 384) f32

    kcat = qkv[:, 0 * E2:1 * E2]      # (TB, 128) = [k0 | k1]   (vreg-aligned slices)
    vcat = qkv[:, 1 * E2:2 * E2]      # (TB, 128) = [v0 | v1]
    qcat = qkv[:, 2 * E2:3 * E2]      # (TB, 128) = [q0*scale | q0*scale]

    # Per-head scores via MXU segmented sum (f32 operands; tiny matmul):
    # d[:, h] = s0_h - s1_h.
    prod = qcat * kcat                                              # (TB, 128) f32
    d = jnp.dot(prod, d_mat_ref[...], preferred_element_type=f32)   # (TB, 4)

    # Exact 2-way softmax: a0 = sigmoid(s0 - s1), a1 = 1 - a0.
    a0 = 1.0 / (1.0 + jnp.exp(-d))                                  # (TB, 4) f32

    # Broadcast per-head weights back to the packed (TB, 128) layout on the MXU:
    # col (pos0, head h) -> a0[h];  col (pos1, head h) -> 1 - a0[h].
    wb = jnp.dot(a0, t_mat_ref[...], preferred_element_type=f32) + pos1_ref[...]
    prod_v = wb * vcat                                              # (TB, 128) = [a0*v0 | a1*v1]

    # attn = (a0*v0 + a1*v1) @ Wo + bo ; fc1 fused: w_a1 = [Wo;Wo] @ W1.
    h1 = jnp.maximum(
        jnp.dot(prod_v.astype(w_a1_ref.dtype), w_a1_ref[...],
                preferred_element_type=f32) + b_a1_ref[...], 0.0)   # (TB, 64)
    h2 = jnp.maximum(
        jnp.dot(h1.astype(w2_ref.dtype), w2_ref[...],
                preferred_element_type=f32) + b2_ref[...], 0.0)     # (TB, 64)

    # Direct 20-column f32 output (full minor dim of the output array).
    o_ref[...] = jnp.dot(h2.astype(w_out_ref.dtype), w_out_ref[...],
                         preferred_element_type=f32) + b_out_ref[...]


def init_params(key):
    """Deterministic PyTorch-style uniform init; weights stored as (in, out)."""
    def linear(key, fan_in, fan_out):
        kw, kb = jax.random.split(key)
        bound = 1.0 / (fan_in ** 0.5)
        w = jax.random.uniform(kw, (fan_in, fan_out), jnp.float32, -bound, bound)
        b = jax.random.uniform(kb, (1, fan_out), jnp.float32, -bound, bound)
        return w, b

    keys = jax.random.split(key, 9)
    p = {}
    p['w_det'], p['b_det'] = linear(keys[0], DET_IN, EMBED_DIM)
    p['w_trk'], p['b_trk'] = linear(keys[1], TRK_IN, EMBED_DIM)
    # in_proj of nn.MultiheadAttention split into q/k/v
    p['w_q'], p['b_q'] = linear(keys[2], EMBED_DIM, EMBED_DIM)
    p['w_k'], p['b_k'] = linear(keys[3], EMBED_DIM, EMBED_DIM)
    p['w_v'], p['b_v'] = linear(keys[4], EMBED_DIM, EMBED_DIM)
    p['w_o'], p['b_o'] = linear(keys[5], EMBED_DIM, EMBED_DIM)
    p['w_fc1'], p['b_fc1'] = linear(keys[6], EMBED_DIM, HIDDEN_DIM)
    p['w_fc2'], p['b_fc2'] = linear(keys[7], HIDDEN_DIM, HIDDEN_DIM)
    p['w_out'], p['b_out'] = linear(keys[8], HIDDEN_DIM, OUT_DIM)
    return p


def pack_params(p, use_bf16=False):
    """Pack PyTorch-layout params into fused, lane-dense kernel operands (one-time)."""
    f32 = jnp.float32
    wdtype = jnp.bfloat16 if use_bf16 else f32
    E = EMBED_DIM

    # Fused QKV weight over the packed [e0 | e1] embedding layout, softmax scale
    # folded into q: columns = [k0 | k1 | v0 | v1 | q0*s | q0*s].
    scale = 1.0 / float(np.sqrt(HEAD_DIM))
    z = jnp.zeros((E, E), f32)
    wq_s, bq_s = p['w_q'] * scale, p['b_q'] * scale
    w_k0 = jnp.concatenate([p['w_k'], z], axis=0)
    w_k1 = jnp.concatenate([z, p['w_k']], axis=0)
    w_v0 = jnp.concatenate([p['w_v'], z], axis=0)
    w_v1 = jnp.concatenate([z, p['w_v']], axis=0)
    w_q0 = jnp.concatenate([wq_s, z], axis=0)
    w_qkv = jnp.concatenate([w_k0, w_k1, w_v0, w_v1, w_q0, w_q0], axis=1)   # (128, 384)
    b_qkv = jnp.concatenate([p['b_k'], p['b_k'], p['b_v'], p['b_v'],
                             bq_s, bq_s], axis=1)                           # (1, 384)

    # Fold the (block-diagonal) embedding into QKV and split by det/trk rows:
    #   e0 (detection token) feeds rows 0:64 of w_qkv, e1 (track token) rows 64:128.
    w_det_qkv = p['w_det'] @ w_qkv[:E, :]                                   # (20, 384)
    w_trk_qkv = p['w_trk'] @ w_qkv[E:, :]                                   # (20, 384)
    b_embqkv = p['b_det'] @ w_qkv[:E, :] + p['b_trk'] @ w_qkv[E:, :] + b_qkv  # (1, 384)

    # Head indicator matrices for the MXU segmented softmax (kept f32 always).
    cols = np.arange(E2)
    pos = cols // E                         # 0 = detection token, 1 = track token
    head = (cols % E) // HEAD_DIM
    d_np = np.zeros((E2, N_HEADS), np.float32)
    d_np[cols, head] = np.where(pos == 0, 1.0, -1.0)                        # (128, 4)
    t_np = d_np.T.copy()                                                    # (4, 128)
    pos1_np = (pos == 1).astype(np.float32)[None, :]                        # (1, 128)

    # Attention out-proj fused with fc1: attn @ W1 = prod_v @ ([Wo;Wo] @ W1).
    wo2 = jnp.concatenate([p['w_o'], p['w_o']], axis=0)                     # (128, 64)
    w_a1 = wo2 @ p['w_fc1']
    b_a1 = p['b_o'] @ p['w_fc1'] + p['b_fc1']

    return {
        'w_det_qkv': w_det_qkv.astype(wdtype),
        'w_trk_qkv': w_trk_qkv.astype(wdtype),
        'b_qkv': b_embqkv.astype(f32),
        'd_mat': jnp.asarray(d_np, f32), 't_mat': jnp.asarray(t_np, f32),
        'pos1': jnp.asarray(pos1_np, f32),
        'w_a1': w_a1.astype(wdtype), 'b_a1': b_a1.astype(f32),
        'w_fc2': p['w_fc2'].astype(wdtype), 'b_fc2': p['b_fc2'].astype(f32),
        'w_out': p['w_out'].astype(wdtype), 'b_out': p['b_out'].astype(f32),
    }


def dqn_forward(detections, tracks, packed, block_b=2048):
    """Batch-tiled Pallas forward. Returns (B, DETECTION_SIZE, ACTION_PER_DET)."""
    B = detections.shape[0]

    # Free contiguous reshapes only -- no host-side concat / astype / pad.
    det = detections.reshape(B, DET_IN).astype(jnp.float32)
    trk = tracks.reshape(B, TRK_IN).astype(jnp.float32)

    # Sublane-aligned batch tile; Pallas handles the ragged edge block (padded
    # reads of garbage rows are harmless -- strictly per-row math -- and
    # out-of-bounds writes are dropped).
    block_b = _round_up(max(block_b, 8), 8)
    tb = min(block_b, _round_up(max(B, 1), 8))
    nb = _cdiv(B, tb)
    if nb == 1 and B > 8:
        # Guarantee >= 2 grid steps so the "parallel" batch axis actually splits
        # across v7x's two TensorCores.
        tb = _round_up(_cdiv(B, 2), 8)
        nb = _cdiv(B, tb)

    weights = (packed['w_det_qkv'], packed['w_trk_qkv'], packed['b_qkv'],
               packed['d_mat'], packed['t_mat'], packed['pos1'],
               packed['w_a1'], packed['b_a1'],
               packed['w_fc2'], packed['b_fc2'],
               packed['w_out'], packed['b_out'])

    in_specs = [pl.BlockSpec((tb, DET_IN), lambda i: (i, 0)),
                pl.BlockSpec((tb, TRK_IN), lambda i: (i, 0))]
    # Weights/biases: constant index_map -> DMA'd once, stay VMEM-resident.
    in_specs += [pl.BlockSpec(w.shape, lambda i: (0, 0)) for w in weights]

    out = pl.pallas_call(
        dqn_kernel,
        out_shape=jax.ShapeDtypeStruct((B, OUT_DIM), jnp.float32),
        grid=(nb,),
        in_specs=in_specs,
        out_specs=pl.BlockSpec((tb, OUT_DIM), lambda i: (i, 0)),
        compiler_params=pltpu.CompilerParams(
            dimension_semantics=("parallel",),          # megacore batch split
            vmem_limit_bytes=32 * 1024 * 1024),         # ~12-15 MB live at tb=2048
    )(det, trk, *weights)

    return out.reshape(B, DETECTION_SIZE, ACTION_PER_DET)


def dqn_forward_ref(detections, tracks, p):
    """Pure-JAX reference (mirrors the PyTorch forward) for correctness checking."""
    B = detections.shape[0]
    e0 = detections.reshape(B, -1) @ p['w_det'] + p['b_det']
    e1 = tracks.reshape(B, -1) @ p['w_trk'] + p['b_trk']
    emb = jnp.stack([e0, e1], axis=1)                            # (B, 2, E)
    q = emb @ p['w_q'] + p['b_q']
    k = emb @ p['w_k'] + p['b_k']
    v = emb @ p['w_v'] + p['b_v']
    qh = q.reshape(B, 2, N_HEADS, HEAD_DIM).transpose(0, 2, 1, 3)
    kh = k.reshape(B, 2, N_HEADS, HEAD_DIM).transpose(0, 2, 1, 3)
    vh = v.reshape(B, 2, N_HEADS, HEAD_DIM).transpose(0, 2, 1, 3)
    scores = jnp.einsum('bhqd,bhkd->bhqk', qh, kh) / (HEAD_DIM ** 0.5)
    w = jax.nn.softmax(scores, axis=-1)
    o = jnp.einsum('bhqk,bhkd->bhqd', w, vh).transpose(0, 2, 1, 3).reshape(B, 2, EMBED_DIM)
    attn = o @ p['w_o'] + p['b_o']
    x = attn[:, 0, :]
    x = jax.nn.relu(x @ p['w_fc1'] + p['b_fc1'])
    x = jax.nn.relu(x @ p['w_fc2'] + p['b_fc2'])
    x = x @ p['w_out'] + p['b_out']
    return x.reshape(B, DETECTION_SIZE, ACTION_PER_DET)


if __name__ == "__main__":
    key = jax.random.PRNGKey(0)
    k_det, k_trk, k_params = jax.random.split(key, 3)

    B = 2
    detections = jax.random.normal(k_det, (B, DETECTION_SIZE, 5), jnp.float32)
    tracks = jax.random.normal(k_trk, (B, TRACK_SIZE, 5), jnp.float32)
    params = init_params(k_params)

    with jax.default_matmul_precision("float32"):   # keep the reference at full f32
        ref = dqn_forward_ref(detections, tracks, params)

    # f32 path (tight check).
    packed_f32 = pack_params(params, use_bf16=False)
    out = jax.block_until_ready(dqn_forward(detections, tracks, packed_f32))
    assert out.shape == (B, DETECTION_SIZE, ACTION_PER_DET)
    assert jnp.allclose(out, ref, atol=2e-3, rtol=2e-3), "f32 mismatch vs reference"

    # Larger ragged batch: exercises >=2 grid steps + Pallas edge-block handling.
    kd2, kt2 = jax.random.split(jax.random.PRNGKey(1), 2)
    B2 = 1000
    det2 = jax.random.normal(kd2, (B2, DETECTION_SIZE, 5), jnp.float32)
    trk2 = jax.random.normal(kt2, (B2, TRACK_SIZE, 5), jnp.float32)
    out2 = jax.block_until_ready(dqn_forward(det2, trk2, packed_f32, block_b=2048))
    with jax.default_matmul_precision("float32"):
        ref2 = dqn_forward_ref(det2, trk2, params)
    assert jnp.allclose(out2, ref2, atol=2e-3, rtol=2e-3), "tiled f32 mismatch vs reference"

    # bf16 matmul-operand path (valid on v5e/v6e/v7x: elementwise math stays f32).
    packed_bf16 = pack_params(params, use_bf16=True)
    out_bf = jax.block_until_ready(dqn_forward(detections, tracks, packed_bf16))
    assert jnp.allclose(out_bf, ref, atol=1e-1, rtol=1e-1), "bf16 mismatch vs reference"

    print("KERNEL_OK")
</pallas_src>

<mosaic_0001>
module attributes {stable_mosaic.version = 11 : i64} {
  func.func @dqn_kernel(%arg0: i32, %arg1: memref<8x20xf32, #tpu.memory_space<vmem>>, %arg2: memref<8x20xf32, #tpu.memory_space<vmem>>, %arg3: memref<20x384xf32, #tpu.memory_space<vmem>>, %arg4: memref<20x384xf32, #tpu.memory_space<vmem>>, %arg5: memref<1x384xf32, #tpu.memory_space<vmem>>, %arg6: memref<128x4xf32, #tpu.memory_space<vmem>>, %arg7: memref<4x128xf32, #tpu.memory_space<vmem>>, %arg8: memref<1x128xf32, #tpu.memory_space<vmem>>, %arg9: memref<128x64xf32, #tpu.memory_space<vmem>>, %arg10: memref<1x64xf32, #tpu.memory_space<vmem>>, %arg11: memref<64x64xf32, #tpu.memory_space<vmem>>, %arg12: memref<1x64xf32, #tpu.memory_space<vmem>>, %arg13: memref<64x20xf32, #tpu.memory_space<vmem>>, %arg14: memref<1x20xf32, #tpu.memory_space<vmem>>, %arg15: memref<8x20xf32, #tpu.memory_space<vmem>>) attributes {dimension_semantics = [#tpu.dimension_semantics<parallel>], iteration_bounds = array<i64: 1>, scalar_prefetch = 0 : i64, scratch_operands = 0 : i64, tpu.core_type = #tpu.core_type<tc>, window_params = [{transform_indices = @transform_0, window_bounds = array<i64: 8, 20>}, {transform_indices = @transform_1, window_bounds = array<i64: 8, 20>}, {pipeline_mode = #tpu.pipeline_mode<synchronous>, transform_indices = @transform_2, window_bounds = array<i64: 20, 384>}, {pipeline_mode = #tpu.pipeline_mode<synchronous>, transform_indices = @transform_3, window_bounds = array<i64: 20, 384>}, {pipeline_mode = #tpu.pipeline_mode<synchronous>, transform_indices = @transform_4, window_bounds = array<i64: 1, 384>}, {pipeline_mode = #tpu.pipeline_mode<synchronous>, transform_indices = @transform_5, window_bounds = array<i64: 128, 4>}, {pipeline_mode = #tpu.pipeline_mode<synchronous>, transform_indices = @transform_6, window_bounds = array<i64: 4, 128>}, {pipeline_mode = #tpu.pipeline_mode<synchronous>, transform_indices = @transform_7, window_bounds = array<i64: 1, 128>}, {pipeline_mode = #tpu.pipeline_mode<synchronous>, transform_indices = @transform_8, window_bounds = array<i64: 128, 64>}, {pipeline_mode = #tpu.pipeline_mode<synchronous>, transform_indices = @transform_9, window_bounds = array<i64: 1, 64>}, {pipeline_mode = #tpu.pipeline_mode<synchronous>, transform_indices = @transform_10, window_bounds = array<i64: 64, 64>}, {pipeline_mode = #tpu.pipeline_mode<synchronous>, transform_indices = @transform_11, window_bounds = array<i64: 1, 64>}, {pipeline_mode = #tpu.pipeline_mode<synchronous>, transform_indices = @transform_12, window_bounds = array<i64: 64, 20>}, {pipeline_mode = #tpu.pipeline_mode<synchronous>, transform_indices = @transform_13, window_bounds = array<i64: 1, 20>}, {transform_indices = @transform_14, window_bounds = array<i64: 8, 20>}]} {
    %c0 = arith.constant 0 : index
    %c0_0 = arith.constant 0 : index
    %0 = vector.load %arg1[%c0, %c0_0] : memref<8x20xf32, #tpu.memory_space<vmem>>, vector<8x20xf32>
    %c0_1 = arith.constant 0 : index
    %c0_2 = arith.constant 0 : index
    %1 = vector.load %arg2[%c0_1, %c0_2] : memref<8x20xf32, #tpu.memory_space<vmem>>, vector<8x20xf32>
    %c0_3 = arith.constant 0 : index
    %c0_4 = arith.constant 0 : index
    %2 = vector.load %arg3[%c0_3, %c0_4] : memref<20x384xf32, #tpu.memory_space<vmem>>, vector<20x384xf32>
    %cst = arith.constant dense<0.000000e+00> : vector<8x384xf32>
    %3 = tpu.matmul %0, %2, %cst {dimension_numbers = #tpu.dot_dimension_numbers<[1], [0], [0], [1], [0, 0, 1, 1], [], []>} : vector<8x20xf32>, vector<20x384xf32>, vector<8x384xf32> -> vector<8x384xf32>
    %c0_5 = arith.constant 0 : index
    %c0_6 = arith.constant 0 : index
    %4 = vector.load %arg4[%c0_5, %c0_6] : memref<20x384xf32, #tpu.memory_space<vmem>>, vector<20x384xf32>
    %cst_7 = arith.constant dense<0.000000e+00> : vector<8x384xf32>
    %5 = tpu.matmul %1, %4, %cst_7 {dimension_numbers = #tpu.dot_dimension_numbers<[1], [0], [0], [1], [0, 0, 1, 1], [], []>} : vector<8x20xf32>, vector<20x384xf32>, vector<8x384xf32> -> vector<8x384xf32>
    %6 = arith.addf %3, %5 : vector<8x384xf32>
    %c0_8 = arith.constant 0 : index
    %c0_9 = arith.constant 0 : index
    %7 = vector.load %arg5[%c0_8, %c0_9] : memref<1x384xf32, #tpu.memory_space<vmem>>, vector<1x384xf32>
    %8 = vector.broadcast %7 : vector<1x384xf32> to vector<8x384xf32>
    %9 = arith.addf %6, %8 : vector<8x384xf32>
    %10 = vector.extract_strided_slice %9 {offsets = [0, 0], sizes = [8, 128], strides = [1, 1]} : vector<8x384xf32> to vector<8x128xf32>
    %11 = vector.extract_strided_slice %9 {offsets = [0, 128], sizes = [8, 128], strides = [1, 1]} : vector<8x384xf32> to vector<8x128xf32>
    %12 = vector.extract_strided_slice %9 {offsets = [0, 256], sizes = [8, 128], strides = [1, 1]} : vector<8x384xf32> to vector<8x128xf32>
    %13 = arith.mulf %12, %10 : vector<8x128xf32>
    %c0_10 = arith.constant 0 : index
    %c0_11 = arith.constant 0 : index
    %14 = vector.load %arg6[%c0_10, %c0_11] : memref<128x4xf32, #tpu.memory_space<vmem>>, vector<128x4xf32>
    %cst_12 = arith.constant dense<0.000000e+00> : vector<8x4xf32>
    %15 = tpu.matmul %13, %14, %cst_12 {dimension_numbers = #tpu.dot_dimension_numbers<[1], [0], [0], [1], [0, 0, 1, 1], [], []>} : vector<8x128xf32>, vector<128x4xf32>, vector<8x4xf32> -> vector<8x4xf32>
    %cst_13 = arith.constant 0.000000e+00 : f32
    %16 = vector.broadcast %cst_13 : f32 to vector<8x4xf32>
    %17 = arith.subf %16, %15 : vector<8x4xf32>
    %18 = math.exp %17 : vector<8x4xf32>
    %cst_14 = arith.constant 1.000000e+00 : f32
    %19 = vector.broadcast %cst_14 : f32 to vector<8x4xf32>
    %20 = arith.addf %19, %18 : vector<8x4xf32>
    %cst_15 = arith.constant 1.000000e+00 : f32
    %21 = vector.broadcast %cst_15 : f32 to vector<8x4xf32>
    %22 = arith.divf %21, %20 : vector<8x4xf32>
    %c0_16 = arith.constant 0 : index
    %c0_17 = arith.constant 0 : index
    %23 = vector.load %arg7[%c0_16, %c0_17] : memref<4x128xf32, #tpu.memory_space<vmem>>, vector<4x128xf32>
    %cst_18 = arith.constant dense<0.000000e+00> : vector<8x128xf32>
    %24 = tpu.matmul %22, %23, %cst_18 {dimension_numbers = #tpu.dot_dimension_numbers<[1], [0], [0], [1], [0, 0, 1, 1], [], []>} : vector<8x4xf32>, vector<4x128xf32>, vector<8x128xf32> -> vector<8x128xf32>
    %c0_19 = arith.constant 0 : index
    %c0_20 = arith.constant 0 : index
    %25 = vector.load %arg8[%c0_19, %c0_20] : memref<1x128xf32, #tpu.memory_space<vmem>>, vector<1x128xf32>
    %26 = vector.broadcast %25 : vector<1x128xf32> to vector<8x128xf32>
    %27 = arith.addf %24, %26 : vector<8x128xf32>
    %28 = arith.mulf %27, %11 : vector<8x128xf32>
    %c0_21 = arith.constant 0 : index
    %c0_22 = arith.constant 0 : index
    %29 = vector.load %arg9[%c0_21, %c0_22] : memref<128x64xf32, #tpu.memory_space<vmem>>, vector<128x64xf32>
    %cst_23 = arith.constant dense<0.000000e+00> : vector<8x64xf32>
    %30 = tpu.matmul %28, %29, %cst_23 {dimension_numbers = #tpu.dot_dimension_numbers<[1], [0], [0], [1], [0, 0, 1, 1], [], []>} : vector<8x128xf32>, vector<128x64xf32>, vector<8x64xf32> -> vector<8x64xf32>
    %c0_24 = arith.constant 0 : index
    %c0_25 = arith.constant 0 : index
    %31 = vector.load %arg10[%c0_24, %c0_25] : memref<1x64xf32, #tpu.memory_space<vmem>>, vector<1x64xf32>
    %32 = vector.broadcast %31 : vector<1x64xf32> to vector<8x64xf32>
    %33 = arith.addf %30, %32 : vector<8x64xf32>
    %cst_26 = arith.constant 0.000000e+00 : f32
    %34 = vector.broadcast %cst_26 : f32 to vector<8x64xf32>
    %35 = arith.maximumf %33, %34 : vector<8x64xf32>
    %c0_27 = arith.constant 0 : index
    %c0_28 = arith.constant 0 : index
    %36 = vector.load %arg11[%c0_27, %c0_28] : memref<64x64xf32, #tpu.memory_space<vmem>>, vector<64x64xf32>
    %cst_29 = arith.constant dense<0.000000e+00> : vector<8x64xf32>
    %37 = tpu.matmul %35, %36, %cst_29 {dimension_numbers = #tpu.dot_dimension_numbers<[1], [0], [0], [1], [0, 0, 1, 1], [], []>} : vector<8x64xf32>, vector<64x64xf32>, vector<8x64xf32> -> vector<8x64xf32>
    %c0_30 = arith.constant 0 : index
    %c0_31 = arith.constant 0 : index
    %38 = vector.load %arg12[%c0_30, %c0_31] : memref<1x64xf32, #tpu.memory_space<vmem>>, vector<1x64xf32>
    %39 = vector.broadcast %38 : vector<1x64xf32> to vector<8x64xf32>
    %40 = arith.addf %37, %39 : vector<8x64xf32>
    %cst_32 = arith.constant 0.000000e+00 : f32
    %41 = vector.broadcast %cst_32 : f32 to vector<8x64xf32>
    %42 = arith.maximumf %40, %41 : vector<8x64xf32>
    %c0_33 = arith.constant 0 : index
    %c0_34 = arith.constant 0 : index
    %43 = vector.load %arg13[%c0_33, %c0_34] : memref<64x20xf32, #tpu.memory_space<vmem>>, vector<64x20xf32>
    %cst_35 = arith.constant dense<0.000000e+00> : vector<8x20xf32>
    %44 = tpu.matmul %42, %43, %cst_35 {dimension_numbers = #tpu.dot_dimension_numbers<[1], [0], [0], [1], [0, 0, 1, 1], [], []>} : vector<8x64xf32>, vector<64x20xf32>, vector<8x20xf32> -> vector<8x20xf32>
    %c0_36 = arith.constant 0 : index
    %c0_37 = arith.constant 0 : index
    %45 = vector.load %arg14[%c0_36, %c0_37] : memref<1x20xf32, #tpu.memory_space<vmem>>, vector<1x20xf32>
    %46 = vector.broadcast %45 : vector<1x20xf32> to vector<8x20xf32>
    %47 = arith.addf %44, %46 : vector<8x20xf32>
    %c0_38 = arith.constant 0 : index
    %c0_39 = arith.constant 0 : index
    %48 = vector.load %arg15[%c0_38, %c0_39] : memref<8x20xf32, #tpu.memory_space<vmem>>, vector<8x20xf32>
    tpu.vector_store %arg15[%c0_38, %c0_39], %47 {strides = array<i32>} : memref<8x20xf32, #tpu.memory_space<vmem>>, vector<8x20xf32>,
    return
  }
  func.func @transform_0(%arg0: i32) -> (i32, i32) {
    %c0_i32 = arith.constant 0 : i32
    %c0_i32_0 = arith.constant 0 : i32
    return %arg0, %c0_i32 : i32, i32
  }
  func.func @transform_1(%arg0: i32) -> (i32, i32) {
    %c0_i32 = arith.constant 0 : i32
    %c0_i32_0 = arith.constant 0 : i32
    return %arg0, %c0_i32 : i32, i32
  }
  func.func @transform_2(%arg0: i32) -> (i32, i32) {
    %c0_i32 = arith.constant 0 : i32
    %c0_i32_0 = arith.constant 0 : i32
    %c0_i32_1 = arith.constant 0 : i32
    return %c0_i32, %c0_i32_0 : i32, i32
  }
  func.func @transform_3(%arg0: i32) -> (i32, i32) {
    %c0_i32 = arith.constant 0 : i32
    %c0_i32_0 = arith.constant 0 : i32
    %c0_i32_1 = arith.constant 0 : i32
    return %c0_i32, %c0_i32_0 : i32, i32
  }
  func.func @transform_4(%arg0: i32) -> (i32, i32) {
    %c0_i32 = arith.constant 0 : i32
    %c0_i32_0 = arith.constant 0 : i32
    %c0_i32_1 = arith.constant 0 : i32
    return %c0_i32, %c0_i32_0 : i32, i32
  }
  func.func @transform_5(%arg0: i32) -> (i32, i32) {
    %c0_i32 = arith.constant 0 : i32
    %c0_i32_0 = arith.constant 0 : i32
    %c0_i32_1 = arith.constant 0 : i32
    return %c0_i32, %c0_i32_0 : i32, i32
  }
  func.func @transform_6(%arg0: i32) -> (i32, i32) {
    %c0_i32 = arith.constant 0 : i32
    %c0_i32_0 = arith.constant 0 : i32
    %c0_i32_1 = arith.constant 0 : i32
    return %c0_i32, %c0_i32_0 : i32, i32
  }
  func.func @transform_7(%arg0: i32) -> (i32, i32) {
    %c0_i32 = arith.constant 0 : i32
    %c0_i32_0 = arith.constant 0 : i32
    %c0_i32_1 = arith.constant 0 : i32
    return %c0_i32, %c0_i32_0 : i32, i32
  }
  func.func @transform_8(%arg0: i32) -> (i32, i32) {
    %c0_i32 = arith.constant 0 : i32
    %c0_i32_0 = arith.constant 0 : i32
    %c0_i32_1 = arith.constant 0 : i32
    return %c0_i32, %c0_i32_0 : i32, i32
  }
  func.func @transform_9(%arg0: i32) -> (i32, i32) {
    %c0_i32 = arith.constant 0 : i32
    %c0_i32_0 = arith.constant 0 : i32
    %c0_i32_1 = arith.constant 0 : i32
    return %c0_i32, %c0_i32_0 : i32, i32
  }
  func.func @transform_10(%arg0: i32) -> (i32, i32) {
    %c0_i32 = arith.constant 0 : i32
    %c0_i32_0 = arith.constant 0 : i32
    %c0_i32_1 = arith.constant 0 : i32
    return %c0_i32, %c0_i32_0 : i32, i32
  }
  func.func @transform_11(%arg0: i32) -> (i32, i32) {
    %c0_i32 = arith.constant 0 : i32
    %c0_i32_0 = arith.constant 0 : i32
    %c0_i32_1 = arith.constant 0 : i32
    return %c0_i32, %c0_i32_0 : i32, i32
  }
  func.func @transform_12(%arg0: i32) -> (i32, i32) {
    %c0_i32 = arith.constant 0 : i32
    %c0_i32_0 = arith.constant 0 : i32
    %c0_i32_1 = arith.constant 0 : i32
    return %c0_i32, %c0_i32_0 : i32, i32
  }
  func.func @transform_13(%arg0: i32) -> (i32, i32) {
    %c0_i32 = arith.constant 0 : i32
    %c0_i32_0 = arith.constant 0 : i32
    %c0_i32_1 = arith.constant 0 : i32
    return %c0_i32, %c0_i32_0 : i32, i32
  }
  func.func @transform_14(%arg0: i32) -> (i32, i32) {
    %c0_i32 = arith.constant 0 : i32
    %c0_i32_0 = arith.constant 0 : i32
    return %arg0, %c0_i32 : i32, i32
  }
}

</mosaic_0001>

<bundles_post_ra>
// kernel: tpu_custom_call.1
= control target key start
LH: loop header
LB: loop body
LE: loop exit
PB: predicated region body
PF: predicated region fallthrough
CT: control target
= control target key end

     0   :  { %19 = vsyncpa [#allocation3], 0  ;;  %v1197_v2 = vmov 0.0|0.0   ;;  %v1198_v7 = vmov 0.0   ;;  %vm1199_vm0 = vmmov 0   ;;  %vm72_vm1 = vcmask 1043456   ;;  %s1572_s0 = inlined_call_operand.vmem [shape: f32[2,20], index: 0, kind: input, shape index: {}]   ;;  %s1573_s1 = inlined_call_operand.vmem [shape: f32[2,20], index: 1, kind: input, shape index: {}]   ;;  %s1574_s2 = inlined_call_operand.vmem [shape: f32[20,384], index: 2, kind: input, shape index: {}]   ;;  %s1575_s3 = inlined_call_operand.vmem [shape: f32[20,384], index: 3, kind: input, shape index: {}]   ;;  %s1576_s4 = inlined_call_operand.vmem [shape: f32[1,384], index: 4, kind: input, shape index: {}]   ;;  %s1577_s5 = inlined_call_operand.vmem [shape: f32[128,4], index: 5, kind: input, shape index: {}]   ;;  %s1578_s6 = inlined_call_operand.vmem [shape: f32[4,128], index: 6, kind: input, shape index: {}]   ;;  %s1579_s7 = inlined_call_operand.vmem [shape: f32[1,128], index: 7, kind: input, shape index: {}]   ;;  %s1580_s8 = inlined_call_operand.vmem [shape: f32[128,64], index: 8, kind: input, shape index: {}]   ;;  %s1581_s9 = inlined_call_operand.vmem [shape: f32[1,64], index: 9, kind: input, shape index: {}]   ;;  %s1582_s10 = inlined_call_operand.vmem [shape: f32[64,64], index: 10, kind: input, shape index: {}]   ;;  %s1583_s11 = inlined_call_operand.vmem [shape: f32[1,64], index: 11, kind: input, shape index: {}]   ;;  %s1584_s12 = inlined_call_operand.vmem [shape: f32[64,20], index: 12, kind: input, shape index: {}]   ;;  %s1585_s13 = inlined_call_operand.vmem [shape: f32[1,20], index: 13, kind: input, shape index: {}]   ;;  %s1586_s14 = inlined_call_operand.hbm [shape: f32[2,20], index: 14, kind: output, shape index: {}]  }
   0x1   :  { %v60_v0 = vld [vmem:[%s1575_s3 + $0x8] sm:$0xff]  ;;  %v63_v1 = vld [vmem:[%s1575_s3 + $0x20] sm:$0xff]  ;;  %1079 = vmatprep.subr.bf16.mxu1 %v1197_v2  ;;  %v61_v4 = vld [vmem:[%s1575_s3 + $0x10] sm:$0xff]  ;;  %146 = vmatprep.mubr.f32.mxu0 %v1198_v7  ;;  %vm68_vm2 = vcmask 162816   ;;  %v378_v46 = vlaneseq  ;;  %vm497_vm3 = vcmask 31744   ;;  %vm684_vm4 = vcmask 523264  }
   0x2   :  { %v1075_v3 = vpack.c.bf16 %v63_v1, %v60_v0  ;;  %v64_v5 = vld [vmem:[%s1575_s3 + $0x28] sm:$0xff]  ;;  %v59_v6 = vld [vmem:[%s1575_s3] sm:$0xff]  ;;  %v62_v9 = vld [vmem:[%s1575_s3 + $0x18] sm:$0xff]  ;;  %950 = vmatprep.mubr.msk.f32.mxu1 %vm1199_vm0, %v1198_v7 }
   0x3   :  { %v1080_v8 = vpack.c.bf16 %v64_v5, %v61_v4  ;;  %v1077_v10 = vpack.c.bf16 %v62_v9, %v59_v6  ;;  %v66_v11 = vld [vmem:[%s1575_s3 + $0x38] sm:$0xf]  ;;  %v51_v12 = vld [vmem:[%s1574_s2 + $0x8] sm:$0xff]  ;;  %v54_v13 = vld [vmem:[%s1574_s2 + $0x20] sm:$0xff]  ;;  %v379_v49 = vshrl.u32 %v378_v46, 7 }
   0x4   :  { %1076 = vmatprep.subr.bf16.mxu0 %v1075_v3  ;;  %v52_v14 = vld [vmem:[%s1574_s2 + $0x10] sm:$0xff]  ;;  %v55_v15 = vld [vmem:[%s1574_s2 + $0x28] sm:$0xff]  ;;  %v67_v16 = vld [vmem:[%s1575_s3 + $0x40] sm:$0xf]  ;;  %v1082_v21 = vpack.c.bf16 %v54_v13, %v51_v12 }
   0x5   :  { %1081 = vmatpush3.bf16.msra.mxu1 %v1080_v8  ;;  %1078 = vmatpush1.bf16.msra.mxu0 %v1077_v10  ;;  %v50_v17 = vld [vmem:[%s1574_s2] sm:$0xff]  ;;  %v53_v18 = vld [vmem:[%s1574_s2 + $0x18] sm:$0xff]  ;;  %v65_v19 = vld [vmem:[%s1575_s3 + $0x30] sm:$0xf]  ;;  %v1087_v22 = vpack.c.bf16 %v55_v15, %v52_v14  ;;  %v384_v51 = vsub.s32 1, %v379_v49  ;;  %v388_v59 = vsub.s32 2, %v379_v49 }
   0x6   :  { %948 = vmatprep.subr.mxu1 %v1198_v7  ;;  %864 = vmatprep.subr.msk.mxu0 %vm72_vm1, %v66_v11  ;;  %v49_v20 = vld [vmem:[%s1573_s1] sm:$0xff]  ;;  %v1084_v23 = vpack.c.bf16 %v53_v18, %v50_v17  ;;  %v57_v24 = vld [vmem:[%s1574_s2 + $0x38] sm:$0xf]  ;;  %v398_v27 = vld [vmem:[%s1577_s5 + $0x8] sm:$0xff]  ;;  %v380_v60 = vsub.s32 0, %v379_v49 }
   0x7   :  { %v58_v25 = vld [vmem:[%s1574_s2 + $0x40] sm:$0xf]  ;;  %v56_v28 = vld [vmem:[%s1574_s2 + $0x30] sm:$0xf]  ;;  %v400_v32 = vld [vmem:[%s1577_s5 + $0x18] sm:$0xff] }
   0x8   :  { %v397_v26 = vld [vmem:[%s1577_s5] sm:$0xff]  ;;  %v399_v31 = vld [vmem:[%s1577_s5 + $0x10] sm:$0xff]  ;;  %v402_v35 = vld [vmem:[%s1577_s5 + $0x28] sm:$0xff] }
   0x9   :  { %949 = vmatpush3.msk.msra.mxu1 %vm72_vm1, %v67_v16  ;;  %865 = vmatpush1.msk.msra.mxu0 %vm72_vm1, %v65_v19  ;;  %v48_v29 = vld [vmem:[%s1572_s0] sm:$0xff]  ;;  %v1090_v30 = vpack.c.bf16 %v398_v27, %v397_v26  ;;  %v1093_v33 = vpack.c.bf16 %v400_v32, %v399_v31  ;;  %v403_v37 = vld [vmem:[%s1577_s5 + $0x30] sm:$0xff]  ;;  %v404_v38 = vld [vmem:[%s1577_s5 + $0x38] sm:$0xff] }
   0xa   :  { %1086 = vmatprep.subr.bf16.mxu1 %v1197_v2  ;;  %866 = vmatmul.mubr.msk.f32.vlgmr.msra.gmra.mrb[0].mxu0 %vm68_vm2, %v49_v20  ;;  %v401_v34 = vld [vmem:[%s1577_s5 + $0x20] sm:$0xff]  ;;  %v1099_v39 = vpack.c.bf16 %v404_v38, %v403_v37  ;;  %v406_v41 = vld [vmem:[%s1577_s5 + $0x48] sm:$0xff]  ;;  %v407_v43 = vld [vmem:[%s1577_s5 + $0x50] sm:$0xff] }
   0xb   :  { %951 = vmatmul.mubr.msk.f32.vlgmr.msra.gmra.mrb[0].mxu1 %vm68_vm2, %v49_v20  ;;  %1083 = vmatprep.subr.bf16.mxu0 %v1082_v21  ;;  %v1096_v36 = vpack.c.bf16 %v402_v35, %v401_v34  ;;  %v405_v40 = vld [vmem:[%s1577_s5 + $0x40] sm:$0xff]  ;;  %v408_v44 = vld [vmem:[%s1577_s5 + $0x58] sm:$0xff]  ;;  %v410_v48 = vld [vmem:[%s1577_s5 + $0x68] sm:$0xff] }
   0xc   :  { %1088 = vmatpush3.bf16.msra.mxu1 %v1087_v22  ;;  %1085 = vmatpush1.bf16.msra.mxu0 %v1084_v23  ;;  %v1102_v42 = vpack.c.bf16 %v406_v41, %v405_v40  ;;  %v1105_v45 = vpack.c.bf16 %v408_v44, %v407_v43  ;;  %v409_v47 = vld [vmem:[%s1577_s5 + $0x60] sm:$0xff]  ;;  %v411_v53 = vld [vmem:[%s1577_s5 + $0x70] sm:$0xff]  ;;  %v412_v54 = vld [vmem:[%s1577_s5 + $0x78] sm:$0xff] }
   0xd   :  { %957 = vmatprep.subr.mxu1 %v1198_v7  ;;  %869 = vmatprep.subr.msk.mxu0 %vm72_vm1, %v57_v24  ;;  %v1108_v50 = vpack.c.bf16 %v410_v48, %v409_v47  ;;  %v376_v52 = vld [vmem:[%s1576_s4] sm:$0x7]  ;;  %v1111_v56 = vpack.c.bf16 %v412_v54, %v411_v53  ;;  %v576_v18 = vld [vmem:[%s1580_s8 + $0x8] sm:$0xff]  ;;  %v577_v20 = vld [vmem:[%s1580_s8 + $0x10] sm:$0xff] }
   0xe   :  { %959 = vmatprep.mubr.msk.f32.mxu1 %vm1199_vm0, %v1198_v7  ;;  %299 = vmatprep.mubr.f32.mxu0 %v1198_v7  ;;  %v385_v55 = vrot.slane %v376_v52, %v384_v51  ;;  %v389_v61 = vrot.slane %v376_v52, %v388_v59  ;;  %v381_v62 = vrot.slane %v376_v52, %v380_v60  ;;  %v489_v10 = vld [vmem:[%s1578_s6] sm:$0xf]  ;;  %v578_v21 = vld [vmem:[%s1580_s8 + $0x18] sm:$0xff]  ;;  %v581_v27 = vld [vmem:[%s1580_s8 + $0x30] sm:$0xff] }
   0xf   :  { %v575_v17 = vld [vmem:[%s1580_s8] sm:$0xff]  ;;  %v1117_v23 = vpack.c.bf16 %v578_v21, %v577_v20  ;;  %v584_v31 = vld [vmem:[%s1580_s8 + $0x48] sm:$0xff]  ;;  %v586_v34 = vld [vmem:[%s1580_s8 + $0x58] sm:$0xff] }
  0x10   :  { %958 = vmatpush3.msk.msra.mxu1 %vm72_vm1, %v58_v25  ;;  %870 = vmatpush1.msk.msra.mxu0 %vm72_vm1, %v56_v28  ;;  %v1114_v19 = vpack.c.bf16 %v576_v18, %v575_v17  ;;  %v579_v24 = vld [vmem:[%s1580_s8 + $0x20] sm:$0xff]  ;;  %v580_v25 = vld [vmem:[%s1580_s8 + $0x28] sm:$0xff]  ;;  %v582_v28 = vld [vmem:[%s1580_s8 + $0x38] sm:$0xff] }
  0x11   :  { %960 = vmatmul.mubr.msk.f32.vlgmr.msra.gmra.mrb[2].mxu1 %vm68_vm2, %v48_v29  ;;  %1089 = vmatprep.subr.bf16.mxu0 %v1197_v2  ;;  %v1120_v26 = vpack.c.bf16 %v580_v25, %v579_v24  ;;  %v588_v37 = vld [vmem:[%s1580_s8 + $0x68] sm:$0xff]  ;;  %v590_v40 = vld [vmem:[%s1580_s8 + $0x78] sm:$0xff]  ;;  %v671_v44 = vld [vmem:[%s1582_s10 + $0x10] sm:$0xff] }
  0x12   :  { %997 = vmatprep.subr.mxu1 %v1198_v7  ;;  %871 = vmatmul.mubr.msk.f32.vlgmr.msra.gmra.mrb[0].mxu0 %vm68_vm2, %v48_v29  ;;  %v1123_v29 = vpack.c.bf16 %v582_v28, %v581_v27  ;;  %v670_v43 = vld [vmem:[%s1582_s10 + $0x8] sm:$0xff]  ;;  %v672_v46 = vld [vmem:[%s1582_s10 + $0x18] sm:$0xff]  ;;  %v673_v48 = vld [vmem:[%s1582_s10 + $0x20] sm:$0xff] }
  0x13   :  { %999 = vmatprep.mubr.msk.f32.mxu1 %vm1199_vm0, %v1198_v7  ;;  %1091 = vmatpush3.bf16.msra.mxu0 %v1090_v30  ;;  %v583_v30 = vld [vmem:[%s1580_s8 + $0x40] sm:$0xff]  ;;  %v1141_v47 = vpack.c.bf16 %v672_v46, %v671_v44  ;;  %v674_v49 = vld [vmem:[%s1582_s10 + $0x28] sm:$0xff] }
  0x14   :  { %994 = vmatprep.mubr.msk.f32.mxu0 %vm1199_vm0, %v1198_v7  ;;  %1092 = vmatprep.subr.bf16.mxu0 %v1197_v2  ;;  %v1126_v32 = vpack.c.bf16 %v584_v31, %v583_v30  ;;  %v874_v51 = vld [vmem:[%s1579_s7] ss:$0 sm:$0xff]  ;;  %v760_v60 = vld [vmem:[%s1584_s12 + $0x8] sm:$0xff] }
  0x15   :  { %998 = vmatpush3.msk.msra.mxu1 %vm72_vm1, %v489_v10  ;;  %v759_v59 = vld [vmem:[%s1584_s12] sm:$0xff]  ;;  %v765_v10 = vld [vmem:[%s1584_s12 + $0x30] sm:$0xff] }
  0x16   :  { %1113 = vmatprep.subr.bf16.mxu1 %v1197_v2  ;;  %v880_v17 = vld [vmem:[%s1585_s13] ss:$0 sm:$0xff] }
  0x17   :  { %1094 = vmatpush3.bf16.msra.mxu0 %v1093_v33  ;;  %v585_v33 = vld [vmem:[%s1580_s8 + $0x50] sm:$0xff] }
  0x18   :  { %1095 = vmatprep.subr.bf16.mxu0 %v1197_v2  ;;  %v1129_v35 = vpack.c.bf16 %v586_v34, %v585_v33 }
  0x1b   :  { %1097 = vmatpush3.bf16.msra.mxu0 %v1096_v36  ;;  %v587_v36 = vld [vmem:[%s1580_s8 + $0x60] sm:$0xff] }
  0x1c   :  { %1098 = vmatprep.subr.bf16.mxu0 %v1197_v2  ;;  %v1132_v38 = vpack.c.bf16 %v588_v37, %v587_v36 }
  0x1f   :  { %1100 = vmatpush3.bf16.msra.mxu0 %v1099_v39  ;;  %v589_v39 = vld [vmem:[%s1580_s8 + $0x70] sm:$0xff] }
  0x20   :  { %1101 = vmatprep.subr.bf16.mxu0 %v1197_v2  ;;  %v1135_v41 = vpack.c.bf16 %v590_v40, %v589_v39 }
  0x23   :  { %1103 = vmatpush3.bf16.msra.mxu0 %v1102_v42  ;;  %v669_v42 = vld [vmem:[%s1582_s10] sm:$0xff] }
  0x24   :  { %1104 = vmatprep.subr.bf16.mxu0 %v1197_v2 }
  0x27   :  { %1106 = vmatpush3.bf16.msra.mxu0 %v1105_v45  ;;  %v1138_v45 = vpack.c.bf16 %v670_v43, %v669_v42 }
  0x28   :  { %1107 = vmatprep.subr.bf16.mxu0 %v1197_v2 }
  0x2b   :  { %1109 = vmatpush3.bf16.msra.mxu0 %v1108_v50  ;;  %v1144_v50 = vpack.c.bf16 %v674_v49, %v673_v48 }
  0x2c   :  { %1110 = vmatprep.subr.bf16.mxu0 %v1197_v2 }
  0x2f   :  { %1112 = vmatpush3.bf16.msra.mxu0 %v1111_v56  ;;  %v675_v56 = vld [vmem:[%s1582_s10 + $0x30] sm:$0xff] }
  0x30   :  { %1137 = vmatprep.subr.bf16.mxu0 %v1197_v2 }
  0xde   :  { %v219_v57 = vpop.f32.mrb[0].mxu1 }
  0xdf   :  { %v952_v58 = vpop.f32.mrb[1].mxu1 }
  0xe4   :  { %v372_v63 = vpop.f32.mrb[2].mxu1 }
  0xe5   :  { %v373_v0 = vadd.f32 %v372_v63, %v219_v57  ;;  %v961_v1 = vpop.f32.mrb[3].mxu1  ;;  %v301_v3 = vpop.f32.mrb[0].mxu0  ;;  %v676_v57 = vld [vmem:[%s1582_s10 + $0x38] sm:$0xff] }
  0xe6   :  { %v393_v5 = vadd.f32 %v381_v62, %v301_v3  ;;  %v303_v6 = vpop.f32.mrb[1].mxu0  ;;  %v1147_v58 = vpack.c.bf16 %v676_v57, %v675_v56  ;;  %v762_v62 = vld [vmem:[%s1584_s12 + $0x18] sm:$0xff]  ;;  %v764_v1 = vld [vmem:[%s1584_s12 + $0x28] sm:$0xff] }
  0xe7   :  { %v395_v4 = vadd.f32 %v389_v61, %v373_v0  ;;  %v1423_v8 = vadd.f32 %v385_v55, %v303_v6  ;;  %v1150_v61 = vpack.c.bf16 %v760_v60, %v759_v59  ;;  %v763_v0 = vld [vmem:[%s1584_s12 + $0x20] sm:$0xff] }
  0xe8   :  { %v1156_v3 = vpack.c.bf16 %v764_v1, %v763_v0 }
  0xe9   :  { %v396_v9 = vmul.f32 %v395_v4, %v393_v5  ;;  %v877_v4 = vld [vmem:[%s1581_s9] ss:$0 sm:$0xff] }
  0xeb   :  { %995 = vmatmul.mubr.f32.vlgmr.msra.gmra.mrb[2].mxu0 %v396_v9 }
  0xec   :  { %1053 = vmatprep.mubr.msk.f32.mxu0 %vm1199_vm0, %v1198_v7  ;;  %1139 = vmatpush3.bf16.msra.mxu0 %v1138_v45 }
  0xed   :  { %1140 = vmatprep.subr.bf16.mxu0 %v1197_v2 }
  0xf0   :  { %1142 = vmatpush3.bf16.msra.mxu0 %v1141_v47 }
  0xf1   :  { %1143 = vmatprep.subr.bf16.mxu0 %v1197_v2 }
  0xf4   :  { %1145 = vmatpush3.bf16.msra.mxu0 %v1144_v50 }
  0xf5   :  { %1146 = vmatprep.subr.bf16.mxu0 %v1197_v2 }
  0xf8   :  { %1148 = vmatpush3.bf16.msra.mxu0 %v1147_v58 }
 0x1be   :  { %v479_v11 = vpop.f32.mrb[2].mxu0 }
 0x1bf   :  { %v483_v12 = vsub.f32 0.0, %v479_v11  ;;  %v996_v13 = vpop.f32.mrb[3].mxu0  ;;  %v766_v11 = vld [vmem:[%s1584_s12 + $0x38] sm:$0xff] }
 0x1c1   :  { %v484_v14 = vmul.f32 1.442695, %v483_v12  ;;  %v1159_v12 = vpack.c.bf16 %v766_v11, %v765_v10 }
 0x1c3   :  { %1169 = vpow2.f32 %v484_v14 }
 0x1cd   :  { %v1170_v15 = vpop.eup %1169 }
 0x1ce   :  { %v486_v16 = vadd.f32 1.0, %v1170_v15 }
 0x1d0   :  { %1171 = vrcp.f32 %v486_v16 }
 0x1da   :  { %v1172_v22 = vpop.eup %1171 }
 0x1db   :  { %1000 = vmatmul.mubr.msk.f32.vlgmr.msra.gmra.mrb[4].mxu1 %vm497_vm3, %v1172_v22 }
 0x1dc   :  { %1115 = vmatpush3.bf16.msra.mxu1 %v1114_v19  ;;  %1034 = vmatprep.mubr.msk.f32.mxu1 %vm1199_vm0, %v1198_v7 }
 0x1dd   :  { %1116 = vmatprep.subr.bf16.mxu1 %v1197_v2 }
 0x1e0   :  { %1118 = vmatpush3.bf16.msra.mxu1 %v1117_v23 }
 0x1e1   :  { %1119 = vmatprep.subr.bf16.mxu1 %v1197_v2 }
 0x1e4   :  { %1121 = vmatpush3.bf16.msra.mxu1 %v1120_v26 }
 0x1e5   :  { %1122 = vmatprep.subr.bf16.mxu1 %v1197_v2 }
 0x1e8   :  { %1124 = vmatpush3.bf16.msra.mxu1 %v1123_v29 }
 0x1e9   :  { %1125 = vmatprep.subr.bf16.mxu1 %v1197_v2 }
 0x1ec   :  { %1127 = vmatpush3.bf16.msra.mxu1 %v1126_v32 }
 0x1ed   :  { %1128 = vmatprep.subr.bf16.mxu1 %v1197_v2 }
 0x1f0   :  { %1130 = vmatpush3.bf16.msra.mxu1 %v1129_v35 }
 0x1f1   :  { %1131 = vmatprep.subr.bf16.mxu1 %v1197_v2 }
 0x1f4   :  { %1133 = vmatpush3.bf16.msra.mxu1 %v1132_v38 }
 0x1f5   :  { %1134 = vmatprep.subr.bf16.mxu1 %v1197_v2 }
 0x1f8   :  { %1136 = vmatpush3.bf16.msra.mxu1 %v1135_v41 }
 0x1f9   :  { %1149 = vmatprep.subr.bf16.mxu1 %v1197_v2 }
 0x2ae   :  { %v570_v52 = vpop.f32.mrb[4].mxu1 }
 0x2af   :  { %v571_v53 = vadd.f32 %v874_v51, %v570_v52  ;;  %v1001_v54 = vpop.f32.mrb[5].mxu1 }
 0x2b1   :  { %v574_v55 = vmul.f32 %v571_v53, %v1423_v8 }
 0x2b3   :  { %1035 = vmatmul.mubr.f32.vlgmr.msra.gmra.mrb[6].mxu1 %v574_v55 }
 0x2b4   :  { %1072 = vmatprep.mubr.msk.f32.mxu1 %vm1199_vm0, %v1198_v7  ;;  %v761_v7 = vld [vmem:[%s1584_s12 + $0x10] sm:$0xff]  ;;  %1151 = vmatpush3.bf16.msra.mxu1 %v1150_v61 }
 0x2b5   :  { %v1153_v63 = vpack.c.bf16 %v762_v62, %v761_v7  ;;  %1152 = vmatprep.subr.bf16.mxu1 %v1197_v2 }
 0x2b8   :  { %1154 = vmatpush3.bf16.msra.mxu1 %v1153_v63 }
 0x2b9   :  { %1155 = vmatprep.subr.bf16.mxu1 %v1197_v2 }
 0x2bc   :  { %1157 = vmatpush3.bf16.msra.mxu1 %v1156_v3 }
 0x2bd   :  { %1158 = vmatprep.subr.bf16.mxu1 %v1197_v2  ;;  %v878_v2 = vld [vmem:[%s1583_s11] ss:$0 sm:$0xff] }
 0x2c0   :  { %1160 = vmatpush3.bf16.msra.mxu1 %v1159_v12 }
 0x386   :  { %v664_v5 = vpop.f32.mrb[6].mxu1 }
 0x387   :  { %v665_v6 = vadd.f32 %v877_v4, %v664_v5  ;;  %v1036_v8 = vpop.f32.mrb[7].mxu1 }
 0x389   :  { %v668_v9 = vmax.f32 %v665_v6, 0.0 }
 0x38b   :  { %1054 = vmatmul.mubr.msk.f32.vlgmr.msra.gmra.mrb[4].mxu0 %vm684_vm4, %v668_v9 }
 0x45e   :  { %v754_v13 = vpop.f32.mrb[4].mxu0 }
 0x45f   :  { %v755_v14 = vadd.f32 %v878_v2, %v754_v13  ;;  %v1055_v15 = vpop.f32.mrb[5].mxu0 }
 0x461   :  { %v758_v16 = vmax.f32 %v755_v14, 0.0 }
 0x463   :  { %1073 = vmatmul.mubr.msk.f32.vlgmr.msra.gmra.mrb[8].mxu1 %vm684_vm4, %v758_v16 }
 0x536   :  { %v843_v18 = vpop.f32.mrb[8].mxu1 }
 0x537   :  { %v844_v19 = vadd.f32 %v880_v17, %v843_v18  ;;  %v1074_v20 = vpop.f32.mrb[9].mxu1 }
 0x539   :  { %847 = vst.msk [vmem:[#allocation2] sm:$0xff] %vm68_vm2, %v844_v19 }
 0x53a   :  { %852 = vsyncadd [#allocation3], 96  ;;  %s1200_s12 = smov [#allocation2]  }
 0x53b   :  { %s853_s4 = sshll.u32 %s1200_s12, 4  ;;  %s854_s4 = int_to_ptr.vmem [resolvable:$true] %s853_s4 }
 0x53c   :  { %s1173_s5 = scalar_lea.vmem %s854_s4, 32  ;;  %s1177_s11 = scalar_lea.vmem %s854_s4, 128 }
 0x53d   :  { %p1174_p0 = scmp.ne.s32.totalorder %s854_s4, %s1173_s5  ;;  %p1178_p1 = scmp.lt.s32.totalorder %s854_s4, %s854_s4 }
 0x53e   :  { %p1179_p2 = scmp.lt.s32.totalorder %s1177_s11, %s1173_s5 }
 0x540   :  { %p1180_p3 = por %p1179_p2, %p1178_p1 }
 0x542   :  { %p1181_p4 = pnand %p1180_p3, %p1174_p0 }
 0x544   :  { %1184 = shalt.err (!%p1181_p4)
}
 0x545   :  { %s1185_s13 = scalar_lea.hbm %s1586_s14, 32 }
 0x546   :  { %p1186_p5 = scmp.ne.s32.totalorder %s1586_s14, %s1185_s13  ;;  %p1189_p6 = scmp.lt.u32.totalorder %s1185_s13, %s1586_s14 }
 0x548   :  { %p1191_p7 = pnand %p1189_p6, %p1186_p5 }
 0x54a   :  { %1194 = shalt.err (!%p1191_p7)
}
 0x54b   :  { %s1201_s17 = smov 32   ;;  %s1202_s18 = smov 2  }
 0x54c   :  { %859 = dma.vmem_to_hbm [thread:$0]  %s854_s4, 32, %s1586_s14, [#allocation3], %s1201_s17, %s1201_s17, %s1202_s18  }
 0x54d   :  { %1195 = dma.done.wait [#allocation3], 128  }
 0x54e   :  { %1196 = vsyncadd [#allocation3], 4294967168 }
 0x54f   :  { %863 = vsyncpa [#allocation3], 1 }

</bundles_post_ra>
